<compile_context>
chip_gen: v7x
topology: tpu7x:2x2x1
jax: 0.10.0
libtpu: 0.0.40
codegen_flags: <defaults>
</compile_context>

<pallas_src>
from functools import partial

import jax
import jax.numpy as jnp
import numpy as np
from jax.experimental import pallas as pl
from jax.experimental.pallas import tpu as pltpu

HIDDEN = 128       # hidden_dim in the PyTorch module
RNN_LAYERS = 2     # rnn_layers in the PyTorch module


def model_kernel(x_ref, h0_ref, w_in_ref, w_rnn_ref, w_sq_ref, b_ref,
                 out_ref, hout_ref, *, num_actions):
    f32 = jnp.float32
    bf16 = jnp.bfloat16

    # Read the recurrent state up-front (hout may alias h0's HBM buffer).
    h_prev0 = h0_ref[0]                                   # (N, H) f32
    h_prev1 = h0_ref[1]

    # Bias slab rows: 0=b1, 1=bih0+bhh0, 2=bih1+bhh1, 3=b2, 4=[ba|bc|0...]
    b1     = b_ref[0:1, :]
    b_rnn0 = b_ref[1:2, :]
    b_rnn1 = b_ref[2:3, :]
    b2     = b_ref[3:4, :]
    b_head = b_ref[4:5, :]

    # ---- self.linear: Linear(2, H) + ReLU --------------------------------
    h = jnp.dot(x_ref[...].astype(bf16), w_in_ref[...],
                preferred_element_type=f32) + b1
    h = jnp.maximum(h, 0.0)                               # (N, H) f32

    # ---- self.rnn: 2-layer single-step tanh RNN, fused [Wih;Whh] ---------
    cat0 = jnp.concatenate([h.astype(bf16), h_prev0.astype(bf16)], axis=-1)
    h0_new = jnp.tanh(
        jnp.dot(cat0, w_rnn_ref[0], preferred_element_type=f32) + b_rnn0)

    cat1 = jnp.concatenate([h0_new.astype(bf16), h_prev1.astype(bf16)],
                           axis=-1)
    h1_new = jnp.tanh(
        jnp.dot(cat1, w_rnn_ref[1], preferred_element_type=f32) + b_rnn1)

    hout_ref[0] = h0_new
    hout_ref[1] = h1_new

    # ---- self.linear2: Linear(H, H) + ReLU -------------------------------
    y = jnp.dot(h1_new.astype(bf16), w_sq_ref[0],
                preferred_element_type=f32) + b2
    y = jnp.maximum(y, 0.0)                               # (N, H) f32

    # ---- fused actor|critic head (single dot, lane-dense 128-col output) -
    head = jnp.dot(y.astype(bf16), w_sq_ref[1],
                   preferred_element_type=f32) + b_head   # (N, H) f32

    # Column-wise LogSoftmax over dim 0 on the full lane-dense tile.
    # Only columns < num_actions are real actor logits; column num_actions
    # holds the raw critic value; higher columns are padding (sliced away).
    m = jnp.max(head, axis=0, keepdims=True)
    z = head - m
    logsm = z - jnp.log(jnp.sum(jnp.exp(z), axis=0, keepdims=True))
    col = jax.lax.broadcasted_iota(jnp.int32, head.shape, dimension=1)
    out_ref[...] = jnp.where(col == num_actions, head, logsm)


def model_forward(x, h0, kp):
    N = x.shape[0]
    A = kp["num_actions"]
    H = HIDDEN

    flops = 2 * N * (2 * H + 2 * (2 * H) * H + H * H + H * H)
    transcendentals = 2 * N * H + N * H            # tanh + softmax exp
    bytes_accessed = (x.size * 4 + h0.size * 4
                      + kp["w_in"].size * 2 + kp["w_rnn"].size * 2
                      + kp["w_sq"].size * 2 + kp["b"].size * 4
                      + N * H * 4 + h0.size * 4)   # outputs

    out, h_new = pl.pallas_call(
        partial(model_kernel, num_actions=A),
        out_shape=(jax.ShapeDtypeStruct((N, H), jnp.float32),
                   jax.ShapeDtypeStruct((RNN_LAYERS, N, H), jnp.float32)),
        in_specs=[pl.BlockSpec(memory_space=pltpu.VMEM)] * 6,
        out_specs=(pl.BlockSpec(memory_space=pltpu.VMEM),
                   pl.BlockSpec(memory_space=pltpu.VMEM)),
        input_output_aliases={1: 1},   # h0 buffer reused for the new hidden
        cost_estimate=pl.CostEstimate(flops=flops,
                                      transcendentals=transcendentals,
                                      bytes_accessed=bytes_accessed),
    )(x, h0, kp["w_in"], kp["w_rnn"], kp["w_sq"], kp["b"])

    actor = out[:, :A]
    critic = out[:, A:A + 1]
    return actor, critic, h_new


def init_params(key, action_count):
    """Raw f32 params; mirrors torch's U(-1/sqrt(fan_in), 1/sqrt(fan_in)).
    Weights stored transposed as (in, out)."""
    def uni(k, shape, fan_in):
        bound = 1.0 / np.sqrt(fan_in)
        return jax.random.uniform(k, shape, jnp.float32, -bound, bound)

    ks = jax.random.split(key, 18)
    p = {}
    p["w1"]   = uni(ks[0],  (2, HIDDEN), 2)
    p["b1"]   = uni(ks[1],  (1, HIDDEN), 2)
    p["wih0"] = uni(ks[2],  (HIDDEN, HIDDEN), HIDDEN)
    p["whh0"] = uni(ks[3],  (HIDDEN, HIDDEN), HIDDEN)
    p["bih0"] = uni(ks[4],  (1, HIDDEN), HIDDEN)
    p["bhh0"] = uni(ks[5],  (1, HIDDEN), HIDDEN)
    p["wih1"] = uni(ks[6],  (HIDDEN, HIDDEN), HIDDEN)
    p["whh1"] = uni(ks[7],  (HIDDEN, HIDDEN), HIDDEN)
    p["bih1"] = uni(ks[8],  (1, HIDDEN), HIDDEN)
    p["bhh1"] = uni(ks[9],  (1, HIDDEN), HIDDEN)
    p["w2"]   = uni(ks[10], (HIDDEN, HIDDEN), HIDDEN)
    p["b2"]   = uni(ks[11], (1, HIDDEN), HIDDEN)
    p["wa"]   = uni(ks[12], (HIDDEN, action_count), HIDDEN)
    p["ba"]   = uni(ks[13], (1, action_count), HIDDEN)
    p["wc"]   = uni(ks[14], (HIDDEN, 1), HIDDEN)
    p["bc"]   = uni(ks[15], (1, 1), HIDDEN)
    return p


def pack_params(p, action_count):
    """Fuse + pack the 18 raw params into 4 kernel inputs (weights in bf16)."""
    bf16 = jnp.bfloat16

    # Per-layer fused RNN weights: (2, 2H, H) = [ [Wih0;Whh0], [Wih1;Whh1] ]
    w_rnn = jnp.stack([
        jnp.concatenate([p["wih0"], p["whh0"]], axis=0),
        jnp.concatenate([p["wih1"], p["whh1"]], axis=0),
    ], axis=0).astype(bf16)

    # Fused actor|critic head, lane-padded to (H, H).
    head_cols = jnp.concatenate([p["wa"], p["wc"]], axis=1)    # (H, A+1)
    w_head = jnp.zeros((HIDDEN, HIDDEN), jnp.float32)
    w_head = w_head.at[:, :action_count + 1].set(head_cols)
    w_sq = jnp.stack([p["w2"], w_head], axis=0).astype(bf16)   # (2, H, H)

    # Bias slab (f32): rows 0..4 used, rest zero.
    b = jnp.zeros((8, HIDDEN), jnp.float32)
    b = b.at[0, :].set(p["b1"][0])
    b = b.at[1, :].set(p["bih0"][0] + p["bhh0"][0])
    b = b.at[2, :].set(p["bih1"][0] + p["bhh1"][0])
    b = b.at[3, :].set(p["b2"][0])
    b = b.at[4, :action_count + 1].set(
        jnp.concatenate([p["ba"][0], p["bc"][0]]))

    return {
        "w_in": p["w1"].astype(bf16),     # (2, H)
        "w_rnn": w_rnn,                   # (2, 2H, H) bf16
        "w_sq": w_sq,                     # (2, H, H)  bf16
        "b": b,                           # (8, H)     f32
        "num_actions": action_count,
    }


def reference_forward(x, h0, p):
    """Pure-JAX f32 reference matching the PyTorch module semantics."""
    h = jax.nn.relu(x @ p["w1"] + p["b1"])
    h0n = jnp.tanh(h @ p["wih0"] + p["bih0"] + h0[0] @ p["whh0"] + p["bhh0"])
    h1n = jnp.tanh(h0n @ p["wih1"] + p["bih1"] + h0[1] @ p["whh1"] + p["bhh1"])
    y = jax.nn.relu(h1n @ p["w2"] + p["b2"])
    logits = y @ p["wa"] + p["ba"]
    actor = jax.nn.log_softmax(logits, axis=0)     # LogSoftmax(dim=0)
    critic = y @ p["wc"] + p["bc"]
    return actor, critic, jnp.stack([h0n, h1n], axis=0)


if __name__ == "__main__":
    N = 8             # batch of states
    ACTIONS = 4       # action_count
    key = jax.random.PRNGKey(0)
    kx, kh, kp = jax.random.split(key, 3)

    x = jax.random.normal(kx, (N, 2), jnp.float32)
    h0 = jax.random.normal(kh, (RNN_LAYERS, N, HIDDEN), jnp.float32)
    raw = init_params(kp, ACTIONS)
    packed = pack_params(raw, ACTIONS)

    # Compute the f32 reference BEFORE the kernel (h0 may be aliased/donated
    # into the kernel's hidden-state output).
    a_ref, c_ref, h_ref = reference_forward(x, h0, raw)
    a_ref, c_ref, h_ref = map(np.asarray, (a_ref, c_ref, h_ref))

    actor, critic, h_new = jax.block_until_ready(model_forward(x, h0, packed))

    # bf16 MXU operands -> relaxed tolerance vs the pure-f32 reference.
    np.testing.assert_allclose(np.asarray(actor), a_ref, rtol=2e-2, atol=2e-2)
    np.testing.assert_allclose(np.asarray(critic), c_ref, rtol=2e-2, atol=2e-2)
    np.testing.assert_allclose(np.asarray(h_new), h_ref, rtol=2e-2, atol=2e-2)

    print("KERNEL_OK")
</pallas_src>

<mosaic_0001>
module attributes {stable_mosaic.version = 11 : i64} {
  func.func @model_kernel(%arg0: memref<8x2xf32, #tpu.memory_space<vmem>>, %arg1: memref<2x8x128xf32, #tpu.memory_space<vmem>>, %arg2: memref<2x128xbf16, #tpu.memory_space<vmem>>, %arg3: memref<2x256x128xbf16, #tpu.memory_space<vmem>>, %arg4: memref<2x128x128xbf16, #tpu.memory_space<vmem>>, %arg5: memref<8x128xf32, #tpu.memory_space<vmem>>, %arg6: memref<8x128xf32, #tpu.memory_space<vmem>>, %arg7: memref<2x8x128xf32, #tpu.memory_space<vmem>>) attributes {dimension_semantics = [], scalar_prefetch = 0 : i64, scratch_operands = 0 : i64, tpu.core_type = #tpu.core_type<tc>} {
    %c0 = arith.constant 0 : index
    %c0_0 = arith.constant 0 : index
    %c0_1 = arith.constant 0 : index
    %0 = vector.load %arg1[%c0, %c0_0, %c0_1] : memref<2x8x128xf32, #tpu.memory_space<vmem>>, vector<1x8x128xf32>
    %1 = vector.shape_cast %0 : vector<1x8x128xf32> to vector<8x128xf32>
    %c1 = arith.constant 1 : index
    %c0_2 = arith.constant 0 : index
    %c0_3 = arith.constant 0 : index
    %2 = vector.load %arg1[%c1, %c0_2, %c0_3] : memref<2x8x128xf32, #tpu.memory_space<vmem>>, vector<1x8x128xf32>
    %3 = vector.shape_cast %2 : vector<1x8x128xf32> to vector<8x128xf32>
    %c0_4 = arith.constant 0 : index
    %c0_5 = arith.constant 0 : index
    %4 = vector.load %arg5[%c0_4, %c0_5] : memref<8x128xf32, #tpu.memory_space<vmem>>, vector<1x128xf32>
    %c1_6 = arith.constant 1 : index
    %c0_7 = arith.constant 0 : index
    %5 = vector.load %arg5[%c1_6, %c0_7] : memref<8x128xf32, #tpu.memory_space<vmem>>, vector<1x128xf32>
    %c2 = arith.constant 2 : index
    %c0_8 = arith.constant 0 : index
    %6 = vector.load %arg5[%c2, %c0_8] : memref<8x128xf32, #tpu.memory_space<vmem>>, vector<1x128xf32>
    %c3 = arith.constant 3 : index
    %c0_9 = arith.constant 0 : index
    %7 = vector.load %arg5[%c3, %c0_9] : memref<8x128xf32, #tpu.memory_space<vmem>>, vector<1x128xf32>
    %c4 = arith.constant 4 : index
    %c0_10 = arith.constant 0 : index
    %8 = vector.load %arg5[%c4, %c0_10] : memref<8x128xf32, #tpu.memory_space<vmem>>, vector<1x128xf32>
    %c0_11 = arith.constant 0 : index
    %c0_12 = arith.constant 0 : index
    %9 = vector.load %arg0[%c0_11, %c0_12] : memref<8x2xf32, #tpu.memory_space<vmem>>, vector<8x2xf32>
    %10 = arith.truncf %9 : vector<8x2xf32> to vector<8x2xbf16>
    %c0_13 = arith.constant 0 : index
    %c0_14 = arith.constant 0 : index
    %11 = vector.load %arg2[%c0_13, %c0_14] : memref<2x128xbf16, #tpu.memory_space<vmem>>, vector<2x128xbf16>
    %cst = arith.constant dense<0.000000e+00> : vector<8x128xf32>
    %12 = tpu.matmul %10, %11, %cst {dimension_numbers = #tpu.dot_dimension_numbers<[1], [0], [0], [1], [0, 0, 1, 1], [], []>} : vector<8x2xbf16>, vector<2x128xbf16>, vector<8x128xf32> -> vector<8x128xf32>
    %13 = vector.broadcast %4 : vector<1x128xf32> to vector<8x128xf32>
    %14 = arith.addf %12, %13 : vector<8x128xf32>
    %cst_15 = arith.constant 0.000000e+00 : f32
    %15 = vector.broadcast %cst_15 : f32 to vector<8x128xf32>
    %16 = arith.maximumf %14, %15 : vector<8x128xf32>
    %17 = arith.truncf %16 : vector<8x128xf32> to vector<8x128xbf16>
    %18 = arith.truncf %1 : vector<8x128xf32> to vector<8x128xbf16>
    %19 = tpu.concatenate %17, %18 in 1 : vector<8x128xbf16>, vector<8x128xbf16> -> vector<8x256xbf16>
    %c0_16 = arith.constant 0 : index
    %c0_17 = arith.constant 0 : index
    %c0_18 = arith.constant 0 : index
    %20 = vector.load %arg3[%c0_16, %c0_17, %c0_18] : memref<2x256x128xbf16, #tpu.memory_space<vmem>>, vector<1x256x128xbf16>
    %21 = vector.shape_cast %20 : vector<1x256x128xbf16> to vector<256x128xbf16>
    %cst_19 = arith.constant dense<0.000000e+00> : vector<8x128xf32>
    %22 = tpu.matmul %19, %21, %cst_19 {dimension_numbers = #tpu.dot_dimension_numbers<[1], [0], [0], [1], [0, 0, 1, 1], [], []>} : vector<8x256xbf16>, vector<256x128xbf16>, vector<8x128xf32> -> vector<8x128xf32>
    %23 = vector.broadcast %5 : vector<1x128xf32> to vector<8x128xf32>
    %24 = arith.addf %22, %23 : vector<8x128xf32>
    %25 = math.tanh %24 : vector<8x128xf32>
    %26 = arith.truncf %25 : vector<8x128xf32> to vector<8x128xbf16>
    %27 = arith.truncf %3 : vector<8x128xf32> to vector<8x128xbf16>
    %28 = tpu.concatenate %26, %27 in 1 : vector<8x128xbf16>, vector<8x128xbf16> -> vector<8x256xbf16>
    %c1_20 = arith.constant 1 : index
    %c0_21 = arith.constant 0 : index
    %c0_22 = arith.constant 0 : index
    %29 = vector.load %arg3[%c1_20, %c0_21, %c0_22] : memref<2x256x128xbf16, #tpu.memory_space<vmem>>, vector<1x256x128xbf16>
    %30 = vector.shape_cast %29 : vector<1x256x128xbf16> to vector<256x128xbf16>
    %cst_23 = arith.constant dense<0.000000e+00> : vector<8x128xf32>
    %31 = tpu.matmul %28, %30, %cst_23 {dimension_numbers = #tpu.dot_dimension_numbers<[1], [0], [0], [1], [0, 0, 1, 1], [], []>} : vector<8x256xbf16>, vector<256x128xbf16>, vector<8x128xf32> -> vector<8x128xf32>
    %32 = vector.broadcast %6 : vector<1x128xf32> to vector<8x128xf32>
    %33 = arith.addf %31, %32 : vector<8x128xf32>
    %34 = math.tanh %33 : vector<8x128xf32>
    %c0_24 = arith.constant 0 : index
    %c0_25 = arith.constant 0 : index
    %c0_26 = arith.constant 0 : index
    %35 = vector.load %arg7[%c0_24, %c0_25, %c0_26] : memref<2x8x128xf32, #tpu.memory_space<vmem>>, vector<1x8x128xf32>
    %36 = vector.shape_cast %35 : vector<1x8x128xf32> to vector<8x128xf32>
    %37 = vector.shape_cast %25 : vector<8x128xf32> to vector<1x8x128xf32>
    tpu.vector_store %arg7[%c0_24, %c0_25, %c0_26], %37 {strides = array<i32>} : memref<2x8x128xf32, #tpu.memory_space<vmem>>, vector<1x8x128xf32>,
    %c1_27 = arith.constant 1 : index
    %c0_28 = arith.constant 0 : index
    %c0_29 = arith.constant 0 : index
    %38 = vector.load %arg7[%c1_27, %c0_28, %c0_29] : memref<2x8x128xf32, #tpu.memory_space<vmem>>, vector<1x8x128xf32>
    %39 = vector.shape_cast %38 : vector<1x8x128xf32> to vector<8x128xf32>
    %40 = vector.shape_cast %34 : vector<8x128xf32> to vector<1x8x128xf32>
    tpu.vector_store %arg7[%c1_27, %c0_28, %c0_29], %40 {strides = array<i32>} : memref<2x8x128xf32, #tpu.memory_space<vmem>>, vector<1x8x128xf32>,
    %41 = arith.truncf %34 : vector<8x128xf32> to vector<8x128xbf16>
    %c0_30 = arith.constant 0 : index
    %c0_31 = arith.constant 0 : index
    %c0_32 = arith.constant 0 : index
    %42 = vector.load %arg4[%c0_30, %c0_31, %c0_32] : memref<2x128x128xbf16, #tpu.memory_space<vmem>>, vector<1x128x128xbf16>
    %43 = vector.shape_cast %42 : vector<1x128x128xbf16> to vector<128x128xbf16>
    %cst_33 = arith.constant dense<0.000000e+00> : vector<8x128xf32>
    %44 = tpu.matmul %41, %43, %cst_33 {dimension_numbers = #tpu.dot_dimension_numbers<[1], [0], [0], [1], [0, 0, 1, 1], [], []>} : vector<8x128xbf16>, vector<128x128xbf16>, vector<8x128xf32> -> vector<8x128xf32>
    %45 = vector.broadcast %7 : vector<1x128xf32> to vector<8x128xf32>
    %46 = arith.addf %44, %45 : vector<8x128xf32>
    %cst_34 = arith.constant 0.000000e+00 : f32
    %47 = vector.broadcast %cst_34 : f32 to vector<8x128xf32>
    %48 = arith.maximumf %46, %47 : vector<8x128xf32>
    %49 = arith.truncf %48 : vector<8x128xf32> to vector<8x128xbf16>
    %c1_35 = arith.constant 1 : index
    %c0_36 = arith.constant 0 : index
    %c0_37 = arith.constant 0 : index
    %50 = vector.load %arg4[%c1_35, %c0_36, %c0_37] : memref<2x128x128xbf16, #tpu.memory_space<vmem>>, vector<1x128x128xbf16>
    %51 = vector.shape_cast %50 : vector<1x128x128xbf16> to vector<128x128xbf16>
    %cst_38 = arith.constant dense<0.000000e+00> : vector<8x128xf32>
    %52 = tpu.matmul %49, %51, %cst_38 {dimension_numbers = #tpu.dot_dimension_numbers<[1], [0], [0], [1], [0, 0, 1, 1], [], []>} : vector<8x128xbf16>, vector<128x128xbf16>, vector<8x128xf32> -> vector<8x128xf32>
    %53 = vector.broadcast %8 : vector<1x128xf32> to vector<8x128xf32>
    %54 = arith.addf %52, %53 : vector<8x128xf32>
    %cst_39 = arith.constant dense<0xFF800000> : vector<128xf32>
    %55 = vector.multi_reduction <maximumf>, %54, %cst_39 [0] : vector<8x128xf32> to vector<128xf32>
    %56 = vector.shape_cast %55 : vector<128xf32> to vector<1x128xf32>
    %57 = vector.broadcast %56 : vector<1x128xf32> to vector<8x128xf32>
    %58 = arith.subf %54, %57 : vector<8x128xf32>
    %59 = math.exp %58 : vector<8x128xf32>
    %cst_40 = arith.constant dense<0.000000e+00> : vector<128xf32>
    %60 = vector.multi_reduction <add>, %59, %cst_40 [0] : vector<8x128xf32> to vector<128xf32>
    %61 = vector.shape_cast %60 : vector<128xf32> to vector<1x128xf32>
    %62 = math.log %61 : vector<1x128xf32>
    %63 = vector.broadcast %62 : vector<1x128xf32> to vector<8x128xf32>
    %64 = arith.subf %58, %63 : vector<8x128xf32>
    %65 = tpu.iota {dimensions = array<i32: 1>} : vector<8x128xi32>
    %c4_i32 = arith.constant 4 : i32
    %66 = vector.broadcast %c4_i32 : i32 to vector<8x128xi32>
    %67 = arith.cmpi eq, %65, %66 : vector<8x128xi32>
    %68 = arith.select %67, %54, %64 : vector<8x128xi1>, vector<8x128xf32>
    %c0_41 = arith.constant 0 : index
    %c0_42 = arith.constant 0 : index
    %69 = vector.load %arg6[%c0_41, %c0_42] : memref<8x128xf32, #tpu.memory_space<vmem>>, vector<8x128xf32>
    tpu.vector_store %arg6[%c0_41, %c0_42], %68 {strides = array<i32>} : memref<8x128xf32, #tpu.memory_space<vmem>>, vector<8x128xf32>,
    return
  }
}

</mosaic_0001>

<bundles_post_ra>
// kernel: tpu_custom_call.1
= control target key start
LH: loop header
LB: loop body
LE: loop exit
PB: predicated region body
PF: predicated region fallthrough
CT: control target
= control target key end

     0   :  { %13 = vsyncpa [#allocation3], 0  ;;  %s1278_s0 = inlined_call_operand.vmem [shape: f32[8,2], index: 0, kind: input, shape index: {}]   ;;  %s1279_s1 = inlined_call_operand.hbm [shape: f32[2,8,128], index: 1, kind: input, shape index: {}, may-alias: {1,7}]   ;;  %s1280_s2 = inlined_call_operand.vmem [shape: bf16[2,128], index: 2, kind: input, shape index: {}]   ;;  %s1281_s3 = inlined_call_operand.hbm [shape: bf16[2,256,128], index: 3, kind: input, shape index: {}]   ;;  %s1282_s4 = inlined_call_operand.hbm [shape: bf16[2,128,128], index: 4, kind: input, shape index: {}]   ;;  %s1283_s5 = inlined_call_operand.vmem [shape: f32[8,128], index: 5, kind: input, shape index: {}]   ;;  %s1284_s6 = inlined_call_operand.hbm [shape: f32[8,128], index: 6, kind: output, shape index: {0}]   ;;  %s1285_s7 = inlined_call_operand.hbm [shape: f32[2,8,128], index: 7, kind: output, shape index: {1}, may-alias: {1,7}]  }
   0x1   :  { %14 = vsyncpa [#allocation6], 0 }
   0x2   :  { %15 = vsyncpa [#allocation4], 0 }
   0x3   :  { %16 = vsyncpa [#allocation10], 0  ;;  %s1111_s24 = smov [#allocation5]   ;;  %s993_s28 = scalar_lea.hbm %s1281_s3, 4096 }
   0x4   :  { %s38_s25 = sshll.u32 %s1111_s24, 4  ;;  %p994_p0 = scmp.ne.s32.totalorder %s1281_s3, %s993_s28  ;;  %s39_s25 = int_to_ptr.vmem [resolvable:$true] %s38_s25 }
   0x5   :  { %p997_p1 = scmp.lt.u32.totalorder %s993_s28, %s1281_s3 }
   0x7   :  { %p999_p2 = pnand %p997_p1, %p994_p0 }
   0x9   :  { %1002 = shalt.err (!%p999_p2)
}
   0xa   :  { %s1003_s10 = scalar_lea.vmem %s39_s25, 4096  ;;  %p1008_p4 = scmp.lt.s32.totalorder %s39_s25, %s39_s25 }
   0xb   :  { %p1004_p3 = scmp.ne.s32.totalorder %s39_s25, %s1003_s10  ;;  %p1009_p5 = scmp.lt.s32.totalorder %s1003_s10, %s1003_s10 }
   0xd   :  { %p1010_p6 = por %p1009_p5, %p1008_p4 }
   0xf   :  { %p1011_p7 = pnand %p1010_p6, %p1004_p3 }
  0x11   :  { %1014 = shalt.err (!%p1011_p7)
}
  0x12   :  { %s1112_s11 = smov 64   ;;  %s1113_s12 = smov 4  }
  0x13   :  { %44 = dma.hbm_to_vmem [thread:$0]  %s1281_s3, 4096, %s39_s25, [#allocation6], %s1112_s11, %s1112_s11, %s1113_s12  }
  0x14   :  { %s1114_s15 = smov [#allocation2]   ;;  %s1015_s19 = scalar_lea.hbm %s1279_s1, 256 }
  0x15   :  { %s24_s16 = sshll.u32 %s1114_s15, 4  ;;  %p1016_p8 = scmp.ne.s32.totalorder %s1279_s1, %s1015_s19  ;;  %s25_s16 = int_to_ptr.vmem [resolvable:$true] %s24_s16 }
  0x16   :  { %p1019_p9 = scmp.lt.u32.totalorder %s1015_s19, %s1279_s1 }
  0x18   :  { %p1021_p10 = pnand %p1019_p9, %p1016_p8 }
  0x1a   :  { %1024 = shalt.err (!%p1021_p10)
}
  0x1b   :  { %s1025_s24 = scalar_lea.vmem %s25_s16, 256  ;;  %p1030_p12 = scmp.lt.s32.totalorder %s25_s16, %s25_s16 }
  0x1c   :  { %p1026_p11 = scmp.ne.s32.totalorder %s25_s16, %s1025_s24  ;;  %p1031_p13 = scmp.lt.s32.totalorder %s1025_s24, %s1025_s24 }
  0x1e   :  { %p1032_p0 = por %p1031_p13, %p1030_p12 }
  0x20   :  { %p1033_p1 = pnand %p1032_p0, %p1026_p11 }
  0x22   :  { %1036 = shalt.err (!%p1033_p1)
}
  0x23   :  { %s1115_s3 = smov 128   ;;  %s1116_s25 = smov 8  }
  0x24   :  { %30 = dma.hbm_to_vmem [thread:$0]  %s1279_s1, 256, %s25_s16, [#allocation3], %s1115_s3, %s1115_s3, %s1116_s25  }
  0x25   :  { %s1117_s28 = smov [#allocation7]   ;;  %s1037_s9 = scalar_lea.hbm %s1282_s4, 2048 }
  0x26   :  { %s50_s29 = sshll.u32 %s1117_s28, 4  ;;  %p1038_p2 = scmp.ne.s32.totalorder %s1282_s4, %s1037_s9  ;;  %s51_s29 = int_to_ptr.vmem [resolvable:$true] %s50_s29 }
  0x27   :  { %p1041_p3 = scmp.lt.u32.totalorder %s1037_s9, %s1282_s4 }
  0x29   :  { %p1043_p4 = pnand %p1041_p3, %p1038_p2 }
  0x2b   :  { %1046 = shalt.err (!%p1043_p4)
}
  0x2c   :  { %s1047_s17 = scalar_lea.vmem %s51_s29, 2048  ;;  %p1052_p6 = scmp.lt.s32.totalorder %s51_s29, %s51_s29 }
  0x2d   :  { %p1048_p5 = scmp.ne.s32.totalorder %s51_s29, %s1047_s17  ;;  %p1053_p7 = scmp.lt.s32.totalorder %s1047_s17, %s1047_s17 }
  0x2f   :  { %p1054_p8 = por %p1053_p7, %p1052_p6 }
  0x31   :  { %p1055_p9 = pnand %p1054_p8, %p1048_p5 }
  0x33   :  { %1058 = shalt.err (!%p1055_p9)
}
  0x34   :  { %56 = dma.hbm_to_vmem [thread:$0]  %s1282_s4, 2048, %s51_s29, [#allocation6], %s1112_s11, %s1112_s11, %s1113_s12  }
  0x35   :  { %1103 = dma.done.wait [#allocation3], 256  }
  0x36   :  { %1104 = vsyncadd [#allocation3], 4294967040 }
  0x37   :  { %1105 = dma.done.wait [#allocation6], 6144  }
  0x38   :  { %1106 = vsyncadd [#allocation6], 4294961152  ;;  %v1118_v0 = vmov 0.0   ;;  %vm1119_vm0 = vmmov 0   ;;  %vm88_vm1 = vcmask 1040384   ;;  %v77_v2 = vld [vmem:[%s1278_s0] sm:$0xff] }
  0x39   :  { %880 = vmatprep.subr.bf16.mxu0 %v1118_v0  ;;  %882 = vmatprep.mubr.msk.bf16.mxu0 %vm1119_vm0, %v1118_v0  ;;  %v79_v1 = vld [vmem:[%s1280_s2] sm:$0x1]  ;;  %v78_v4 = vpack.c.bf16 %v77_v2, %v77_v2  ;;  %v937_v5 = vld [vmem:[#allocation5 + $0x40] sm:$0xff]   ;;  %vm84_vm2 = vcmask 15360   ;;  %v939_v7 = vld [vmem:[#allocation5 + $0x48] sm:$0xff]   ;;  %s1120_s26 = smov [#allocation9]  }
  0x3a   :  { %v90_v3 = vsel %vm88_vm1, %v79_v1, 0  ;;  %v938_v6 = vld [vmem:[#allocation5] sm:$0xff]   ;;  %818 = vmatprep.subr.bf16.mxu1 %v937_v5  ;;  %v940_v8 = vld [vmem:[#allocation5 + $0x8] sm:$0xff]   ;;  %v941_v9 = vld [vmem:[#allocation5 + $0x50] sm:$0xff]   ;;  %s745_s27 = sshll.u32 %s1120_s26, 4  ;;  %s746_s27 = int_to_ptr.vmem [resolvable:$true] %s745_s27 }
  0x3b   :  { %881 = vmatpush3.bf16.msra.mxu0 %v90_v3  ;;  %819 = vmatpush3.bf16.msra.mxu1 %v938_v6  ;;  %v942_v10 = vld [vmem:[#allocation5 + $0x10] sm:$0xff]   ;;  %v943_v11 = vld [vmem:[#allocation5 + $0x58] sm:$0xff]   ;;  %v945_v13 = vld [vmem:[#allocation5 + $0x60] sm:$0xff]   ;;  %s1059_s28 = scalar_lea.vmem %s746_s27, 256  ;;  %p1064_p11 = scmp.lt.s32.totalorder %s746_s27, %s746_s27 }
  0x3c   :  { %820 = vmatprep.subr.bf16.mxu1 %v939_v7  ;;  %v944_v12 = vld [vmem:[#allocation5 + $0x18] sm:$0xff]   ;;  %v946_v14 = vld [vmem:[#allocation5 + $0x20] sm:$0xff]   ;;  %v947_v15 = vld [vmem:[#allocation5 + $0x68] sm:$0xff]   ;;  %p1060_p10 = scmp.ne.s32.totalorder %s746_s27, %s1059_s28  ;;  %p1065_p12 = scmp.lt.s32.totalorder %s1059_s28, %s1059_s28 }
  0x3d   :  { %v948_v16 = vld [vmem:[#allocation5 + $0x28] sm:$0xff]   ;;  %v949_v17 = vld [vmem:[#allocation5 + $0x70] sm:$0xff]   ;;  %v951_v19 = vld [vmem:[#allocation5 + $0x78] sm:$0xff]  }
  0x3e   :  { %883 = vmatmul.mubr.msk.bf16.vlgmr.msra.gmra.mrb[0].mxu0 %vm84_vm2, %v78_v4  ;;  %v950_v18 = vld [vmem:[#allocation5 + $0x30] sm:$0xff]   ;;  %v952_v20 = vld [vmem:[#allocation5 + $0x38] sm:$0xff]   ;;  %v953_v23 = vld [vmem:[#allocation5 + $0xc0] sm:$0xff]   ;;  %p1066_p13 = por %p1065_p12, %p1064_p11 }
  0x3f   :  { %821 = vmatpush3.bf16.msra.mxu1 %v940_v8  ;;  %v69_v21 = vld [vmem:[#allocation2] sm:$0xff]  ;;  %v954_v24 = vld [vmem:[#allocation5 + $0x80] sm:$0xff]   ;;  %v955_v25 = vld [vmem:[#allocation5 + $0xc8] sm:$0xff]   ;;  %840 = vmatprep.subr.bf16.mxu0 %v953_v23 }
  0x40   :  { %822 = vmatprep.subr.bf16.mxu1 %v941_v9  ;;  %v134_v22 = vpack.c.bf16 %v69_v21, %v69_v21  ;;  %841 = vmatpush3.bf16.msra.mxu0 %v954_v24  ;;  %v956_v26 = vld [vmem:[#allocation5 + $0x88] sm:$0xff]   ;;  %v957_v27 = vld [vmem:[#allocation5 + $0xd0] sm:$0xff]   ;;  %v959_v29 = vld [vmem:[#allocation5 + $0xd8] sm:$0xff]   ;;  %p1067_p0 = pnand %p1066_p13, %p1060_p10 }
  0x41   :  { %842 = vmatprep.subr.bf16.mxu0 %v955_v25  ;;  %v958_v28 = vld [vmem:[#allocation5 + $0x90] sm:$0xff]   ;;  %v960_v38 = vld [vmem:[#allocation5 + $0x98] sm:$0xff]   ;;  %v961_v39 = vld [vmem:[#allocation5 + $0xe0] sm:$0xff]  }
  0x42   :  { %299 = vmatprep.mubr.bf16.mxu1 %v134_v22  ;;  %v762_v30 = vld [vmem:[%s1283_s5] ss:$0 sm:$0xff]  ;;  %v962_v40 = vld [vmem:[#allocation5 + $0xa0] sm:$0xff]   ;;  %v963_v41 = vld [vmem:[#allocation5 + $0xe8] sm:$0xff]  }
  0x43   :  { %823 = vmatpush3.bf16.msra.mxu1 %v942_v10  ;;  %v964_v42 = vld [vmem:[#allocation5 + $0xa8] sm:$0xff]   ;;  %v965_v43 = vld [vmem:[#allocation5 + $0xf0] sm:$0xff]   ;;  %v967_v45 = vld [vmem:[#allocation5 + $0xf8] sm:$0xff]  }
  0x44   :  { %824 = vmatprep.subr.bf16.mxu1 %v943_v11  ;;  %843 = vmatpush3.bf16.msra.mxu0 %v956_v26  ;;  %v966_v44 = vld [vmem:[#allocation5 + $0xb0] sm:$0xff]   ;;  %v968_v46 = vld [vmem:[#allocation5 + $0xb8] sm:$0xff]   ;;  %v969_v49 = vld [vmem:[#allocation7] sm:$0xff]  }
  0x45   :  { %844 = vmatprep.subr.bf16.mxu0 %v957_v27  ;;  %v71_v47 = vld [vmem:[#allocation2 + $0x8] sm:$0xff]  ;;  %v970_v50 = vld [vmem:[#allocation7 + $0x8] sm:$0xff]   ;;  %v971_v51 = vld [vmem:[#allocation7 + $0x10] sm:$0xff]  }
  0x46   :  { %v309_v48 = vpack.c.bf16 %v71_v47, %v71_v47  ;;  %v764_v53 = vld [vmem:[%s1283_s5 + $0x1] ss:$0 sm:$0xff]  ;;  %v972_v61 = vld [vmem:[#allocation7 + $0x18] sm:$0xff]   ;;  %v973_v62 = vld [vmem:[#allocation7 + $0x20] sm:$0xff]  }
  0x47   :  { %825 = vmatpush3.bf16.msra.mxu1 %v944_v12  ;;  %v974_v63 = vld [vmem:[#allocation7 + $0x28] sm:$0xff]   ;;  %v975_v1 = vld [vmem:[#allocation7 + $0x30] sm:$0xff]   ;;  %v976_v2 = vld [vmem:[#allocation7 + $0x38] sm:$0xff]  }
  0x48   :  { %826 = vmatprep.subr.bf16.mxu1 %v945_v13  ;;  %845 = vmatpush3.bf16.msra.mxu0 %v958_v28  ;;  %v977_v3 = vld [vmem:[#allocation7 + $0x40] sm:$0xff]   ;;  %v978_v4 = vld [vmem:[#allocation7 + $0x48] sm:$0xff]   ;;  %v979_v5 = vld [vmem:[#allocation7 + $0x50] sm:$0xff]  }
  0x49   :  { %846 = vmatprep.subr.bf16.mxu0 %v959_v29  ;;  %475 = vmatprep.mubr.bf16.mxu0 %v309_v48  ;;  %v980_v6 = vld [vmem:[#allocation7 + $0x58] sm:$0xff]   ;;  %v981_v7 = vld [vmem:[#allocation7 + $0x60] sm:$0xff]   ;;  %v982_v8 = vld [vmem:[#allocation7 + $0x68] sm:$0xff]  }
  0x4a   :  { %v781_v10 = vld [vmem:[%s1283_s5 + $0x2] ss:$0 sm:$0xff] }
  0x4b   :  { %827 = vmatpush3.bf16.msra.mxu1 %v946_v14 }
  0x4c   :  { %828 = vmatprep.subr.bf16.mxu1 %v947_v15  ;;  %847 = vmatpush3.bf16.msra.mxu0 %v960_v38 }
  0x4d   :  { %848 = vmatprep.subr.bf16.mxu0 %v961_v39 }
  0x4f   :  { %829 = vmatpush3.bf16.msra.mxu1 %v948_v16 }
  0x50   :  { %830 = vmatprep.subr.bf16.mxu1 %v949_v17  ;;  %849 = vmatpush3.bf16.msra.mxu0 %v962_v40 }
  0x51   :  { %850 = vmatprep.subr.bf16.mxu0 %v963_v41 }
  0x53   :  { %831 = vmatpush3.bf16.msra.mxu1 %v950_v18  ;;  %v983_v18 = vld [vmem:[#allocation7 + $0x70] sm:$0xff]  }
  0x54   :  { %832 = vmatprep.subr.bf16.mxu1 %v951_v19  ;;  %851 = vmatpush3.bf16.msra.mxu0 %v964_v42  ;;  %v984_v19 = vld [vmem:[#allocation7 + $0x78] sm:$0xff]  }
  0x55   :  { %852 = vmatprep.subr.bf16.mxu0 %v965_v43 }
  0x57   :  { %833 = vmatpush3.bf16.msra.mxu1 %v952_v20  ;;  %v798_v20 = vld [vmem:[%s1283_s5 + $0x3] ss:$0 sm:$0xff] }
  0x58   :  { %886 = vmatprep.subr.bf16.mxu1 %v1118_v0  ;;  %853 = vmatpush3.bf16.msra.mxu0 %v966_v44 }
  0x59   :  { %854 = vmatprep.subr.bf16.mxu0 %v967_v45 }
  0x5c   :  { %855 = vmatpush3.bf16.msra.mxu0 %v968_v46 }
  0x5d   :  { %906 = vmatprep.subr.bf16.mxu0 %v1118_v0 }
 0x111   :  { %v126_v31 = vpop.f32.mrb[0].mxu0 }
 0x112   :  { %v127_v32 = vadd.f32 %v762_v30, %v126_v31  ;;  %v884_v33 = vpop.f32.mrb[1].mxu0 }
 0x113   :  { %v129_v34 = vpop.f32.mrb[2].mxu0 }
 0x114   :  { %v132_v35 = vmax.f32 %v127_v32, 0.0  ;;  %v885_v36 = vpop.f32.mrb[3].mxu0 }
 0x116   :  { %v133_v37 = vpack.c.bf16 %v132_v35, %v132_v35 }
 0x118   :  { %300 = vmatmul.mubr.bf16.vlgmr.msra.gmra.mrb[0].mxu1 %v133_v37 }
 0x119   :  { %902 = vmatprep.mubr.msk.bf16.mxu1 %vm1119_vm0, %v1118_v0  ;;  %887 = vmatpush3.bf16.msra.mxu1 %v969_v49 }
 0x11a   :  { %888 = vmatprep.subr.bf16.mxu1 %v1118_v0 }
 0x11d   :  { %889 = vmatpush3.bf16.msra.mxu1 %v970_v50 }
 0x11e   :  { %890 = vmatprep.subr.bf16.mxu1 %v1118_v0 }
 0x121   :  { %891 = vmatpush3.bf16.msra.mxu1 %v971_v51 }
 0x122   :  { %892 = vmatprep.subr.bf16.mxu1 %v1118_v0 }
 0x125   :  { %893 = vmatpush3.bf16.msra.mxu1 %v972_v61 }
 0x126   :  { %894 = vmatprep.subr.bf16.mxu1 %v1118_v0 }
 0x129   :  { %895 = vmatpush3.bf16.msra.mxu1 %v973_v62 }
 0x12a   :  { %896 = vmatprep.subr.bf16.mxu1 %v1118_v0 }
 0x12d   :  { %897 = vmatpush3.bf16.msra.mxu1 %v974_v63 }
 0x12e   :  { %898 = vmatprep.subr.bf16.mxu1 %v1118_v0 }
 0x131   :  { %899 = vmatpush3.bf16.msra.mxu1 %v975_v1 }
 0x132   :  { %900 = vmatprep.subr.bf16.mxu1 %v1118_v0 }
 0x135   :  { %901 = vmatpush3.bf16.msra.mxu1 %v976_v2 }
 0x1eb   :  { %v834_v52 = vpop.f32.mrb[0].mxu1 }
 0x1ec   :  { %v835_v54 = vpop.f32.mrb[1].mxu1 }
 0x1ed   :  { %v836_v55 = vadd.f32 %v835_v54, %v834_v52  ;;  %v837_v56 = vpop.f32.mrb[2].mxu1 }
 0x1ee   :  { %v838_v57 = vpop.f32.mrb[3].mxu1 }
 0x1ef   :  { %v302_v58 = vadd.f32 %v836_v55, %v764_v53 }
 0x1f1   :  { %985 = vtanh.f32 %v302_v58 }
 0x1fb   :  { %v986_v59 = vpop.eup %985 }
 0x1fc   :  { %484 = vst [vmem:[#allocation9] sm:$0xff] %v986_v59  ;;  %v308_v60 = vpack.c.bf16 %v986_v59, %v986_v59 }
 0x1fe   :  { %476 = vmatmul.mubr.bf16.vlgmr.msra.gmra.mrb[4].mxu0 %v308_v60 }
 0x1ff   :  { %922 = vmatprep.mubr.msk.bf16.mxu0 %vm1119_vm0, %v1118_v0  ;;  %907 = vmatpush3.bf16.msra.mxu0 %v977_v3 }
 0x200   :  { %908 = vmatprep.subr.bf16.mxu0 %v1118_v0 }
 0x203   :  { %909 = vmatpush3.bf16.msra.mxu0 %v978_v4 }
 0x204   :  { %910 = vmatprep.subr.bf16.mxu0 %v1118_v0 }
 0x207   :  { %911 = vmatpush3.bf16.msra.mxu0 %v979_v5 }
 0x208   :  { %912 = vmatprep.subr.bf16.mxu0 %v1118_v0 }
 0x20b   :  { %913 = vmatpush3.bf16.msra.mxu0 %v980_v6 }
 0x20c   :  { %914 = vmatprep.subr.bf16.mxu0 %v1118_v0 }
 0x20f   :  { %915 = vmatpush3.bf16.msra.mxu0 %v981_v7 }
 0x210   :  { %916 = vmatprep.subr.bf16.mxu0 %v1118_v0 }
 0x213   :  { %917 = vmatpush3.bf16.msra.mxu0 %v982_v8 }
 0x214   :  { %918 = vmatprep.subr.bf16.mxu0 %v1118_v0 }
 0x217   :  { %919 = vmatpush3.bf16.msra.mxu0 %v983_v18 }
 0x218   :  { %920 = vmatprep.subr.bf16.mxu0 %v1118_v0 }
 0x21b   :  { %921 = vmatpush3.bf16.msra.mxu0 %v984_v19 }
 0x2d1   :  { %v856_v9 = vpop.f32.mrb[4].mxu0 }
 0x2d2   :  { %v857_v11 = vpop.f32.mrb[5].mxu0 }
 0x2d3   :  { %v858_v12 = vadd.f32 %v857_v11, %v856_v9  ;;  %v859_v13 = vpop.f32.mrb[6].mxu0 }
 0x2d4   :  { %v860_v14 = vpop.f32.mrb[7].mxu0 }
 0x2d5   :  { %v478_v15 = vadd.f32 %v858_v12, %v781_v10 }
 0x2d7   :  { %987 = vtanh.f32 %v478_v15 }
 0x2e1   :  { %v988_v16 = vpop.eup %987 }
 0x2e2   :  { %486 = vst [vmem:[#allocation9 + $0x8] sm:$0xff] %v988_v16  ;;  %v487_v17 = vpack.c.bf16 %v988_v16, %v988_v16 }
 0x2e4   :  { %903 = vmatmul.mubr.bf16.vlgmr.msra.gmra.mrb[4].mxu1 %v487_v17 }
 0x3b7   :  { %v590_v21 = vpop.f32.mrb[4].mxu1 }
 0x3b8   :  { %v591_v22 = vadd.f32 %v798_v20, %v590_v21  ;;  %v904_v23 = vpop.f32.mrb[5].mxu1 }
 0x3b9   :  { %v593_v24 = vpop.f32.mrb[6].mxu1 }
 0x3ba   :  { %v596_v25 = vmax.f32 %v591_v22, 0.0  ;;  %v905_v26 = vpop.f32.mrb[7].mxu1 }
 0x3bc   :  { %v597_v27 = vpack.c.bf16 %v596_v25, %v596_v25 }
 0x3be   :  { %923 = vmatmul.mubr.bf16.vlgmr.msra.gmra.mrb[8].mxu0 %v597_v27 }
 0x3bf   :  { %1070 = shalt.err (!%p1067_p0)
}
 0x3c0   :  { %s1071_s8 = scalar_lea.hbm %s1285_s7, 256 }
 0x3c1   :  { %p1072_p1 = scmp.ne.s32.totalorder %s1285_s7, %s1071_s8  ;;  %p1075_p2 = scmp.lt.u32.totalorder %s1071_s8, %s1285_s7 }
 0x3c3   :  { %p1077_p3 = pnand %p1075_p2, %p1072_p1 }
 0x3c5   :  { %1080 = shalt.err (!%p1077_p3)
}
 0x3c6   :  { %751 = dma.vmem_to_hbm [thread:$0]  %s746_s27, 256, %s1285_s7, [#allocation10], %s1115_s3, %s1115_s3, %s1116_s25   ;;  %v725_v48 = vlaneseq }
 0x3c7   :  { %v807_v0 = vld [vmem:[%s1283_s5 + $0x4] ss:$0 sm:$0xff]  ;;  %s1121_s5 = smov [#allocation8]  }
 0x3c8   :  { %v726_v49 = vand.u32 127, %v725_v48  ;;  %s736_s7 = sshll.u32 %s1121_s5, 4  ;;  %s737_s7 = int_to_ptr.vmem [resolvable:$true] %s736_s7 }
 0x3c9   :  { %s1081_s3 = scalar_lea.vmem %s737_s7, 128  ;;  %p1086_p5 = scmp.lt.s32.totalorder %s737_s7, %s737_s7 }
 0x3ca   :  { %vm727_vm3 = vcmp.eq.s32.totalorder %v726_v49, 4  ;;  %p1082_p4 = scmp.ne.s32.totalorder %s737_s7, %s1081_s3  ;;  %p1087_p6 = scmp.lt.s32.totalorder %s1081_s3, %s1081_s3 }
 0x3cc   :  { %p1088_p7 = por %p1087_p6, %p1086_p5 }
 0x3ce   :  { %p1089_p8 = pnand %p1088_p7, %p1082_p4 }
 0x491   :  { %v701_v28 = vpop.f32.mrb[8].mxu0 }
 0x492   :  { %v702_v29 = vadd.f32 %v807_v0, %v701_v28  ;;  %v924_v30 = vpop.f32.mrb[9].mxu0 }
 0x493   :  { %v704_v31 = vpop.f32.mrb[10].mxu0 }
 0x494   :  { %v707_v32 = vrot.slane %v702_v29, 4  ;;  %v925_v33 = vpop.f32.mrb[11].mxu0 }
 0x496   :  { %v708_v34 = vmax.f32 %v702_v29, %v707_v32 }
 0x498   :  { %v709_v35 = vrot.slane %v708_v34, 2 }
 0x49a   :  { %v710_v36 = vmax.f32 %v708_v34, %v709_v35 }
 0x49c   :  { %v711_v37 = vrot.slane %v710_v36, 1 }
 0x49e   :  { %v712_v38 = vmax.f32 %v710_v36, %v711_v37 }
 0x4a0   :  { %v713_v39 = vsub.f32 %v702_v29, %v712_v38 }
 0x4a2   :  { %v714_v40 = vmul.f32 1.442695, %v713_v39 }
 0x4a4   :  { %989 = vpow2.f32 %v714_v40 }
 0x4ae   :  { %v990_v41 = vpop.eup %989 }
 0x4af   :  { %v716_v42 = vrot.slane %v990_v41, 4 }
 0x4b1   :  { %v717_v43 = vadd.f32 %v990_v41, %v716_v42 }
 0x4b3   :  { %v718_v44 = vrot.slane %v717_v43, 2 }
 0x4b5   :  { %v719_v45 = vadd.f32 %v718_v44, %v717_v43 }
 0x4b7   :  { %v720_v46 = vrot.slane %v719_v45, 1 }
 0x4b9   :  { %v721_v47 = vadd.f32 %v720_v46, %v719_v45 }
 0x4bb   :  { %991 = vlog2.f32 %v721_v47 }
 0x4c5   :  { %v992_v50 = vpop.eup %991 }
 0x4c6   :  { %v723_v51 = vmul.f32 0.6931472, %v992_v50 }
 0x4c8   :  { %v724_v52 = vsub.f32 %v713_v39, %v723_v51 }
 0x4ca   :  { %v728_v53 = vsel %vm727_vm3, %v702_v29, %v724_v52 }
 0x4cb   :  { %729 = vst [vmem:[#allocation8] sm:$0xff] %v728_v53 }
 0x4cc   :  { %1092 = shalt.err (!%p1089_p8)
}
 0x4cd   :  { %s1093_s19 = scalar_lea.hbm %s1284_s6, 128 }
 0x4ce   :  { %p1094_p9 = scmp.ne.s32.totalorder %s1284_s6, %s1093_s19  ;;  %p1097_p10 = scmp.lt.u32.totalorder %s1093_s19, %s1284_s6 }
 0x4d0   :  { %p1099_p11 = pnand %p1097_p10, %p1094_p9 }
 0x4d2   :  { %1102 = shalt.err (!%p1099_p11)
}
 0x4d3   :  { %739 = dma.vmem_to_hbm [thread:$0]  %s737_s7, 128, %s1284_s6, [#allocation4]  }
 0x4d4   :  { %1107 = dma.done.wait [#allocation4], 128  }
 0x4d5   :  { %1108 = vsyncadd [#allocation4], 4294967168 }
 0x4d6   :  { %1109 = dma.done.wait [#allocation10], 256  }
 0x4d7   :  { %1110 = vsyncadd [#allocation10], 4294967040 }
 0x4d8   :  { %758 = vsyncpa [#allocation3], 1 }
 0x4d9   :  { %759 = vsyncpa [#allocation6], 1 }
 0x4da   :  { %760 = vsyncpa [#allocation4], 1 }
 0x4db   :  { %761 = vsyncpa [#allocation10], 1 }

</bundles_post_ra>
